<compile_context>
chip_gen: v6e
topology: v6e:2x2x1
jax: 0.10.0
libtpu: 0.0.40
codegen_flags: <defaults>
</compile_context>

<pallas_src>
import functools

import jax
import jax.numpy as jnp
from jax import lax
from jax.experimental import pallas as pl
from jax.experimental.pallas import tpu as pltpu


# ----------------------------------------------------------------------------
# small helpers used inside kernels
# ----------------------------------------------------------------------------
def _mm_t(a, b):
    """a @ b.T with f32 accumulation (b is (out_features, in_features), torch Linear layout)."""
    return lax.dot_general(a, b, (((a.ndim - 1,), (b.ndim - 1,)), ((), ())),
                           preferred_element_type=jnp.float32)


def _layernorm(x, gamma, beta, eps=1e-5):
    mu = jnp.mean(x, axis=-1, keepdims=True)
    xc = x - mu
    var = jnp.mean(xc * xc, axis=-1, keepdims=True)
    return xc * lax.rsqrt(var + eps) * gamma + beta


# ----------------------------------------------------------------------------
# kernel: fused embedding  y = [x | lap] @ [We | Wl]^T + bl   (row tiled over B*N)
# ----------------------------------------------------------------------------
def embed_kernel(xl_ref, w_ref, b_ref, o_ref):
    o_ref[...] = _mm_t(xl_ref[...].astype(jnp.bfloat16), w_ref[...]) + b_ref[...]


def fused_embedding(x_pad, lap_pad, w_cat_bf16, bias):
    B, Np, _ = x_pad.shape
    d = w_cat_bf16.shape[0]
    xl = jnp.concatenate([x_pad, lap_pad], axis=-1)      # (B, Np, in+lap)
    F = xl.shape[-1]
    M = B * Np
    TM = 128
    for cand in (1024, 512, 256, 128):
        if M % cand == 0:
            TM = cand
            break
    out = pl.pallas_call(
        embed_kernel,
        out_shape=jax.ShapeDtypeStruct((M, d), jnp.float32),
        grid=(M // TM,),
        in_specs=[pl.BlockSpec((TM, F), lambda i: (i, 0)),
                  pl.BlockSpec((d, F), lambda i: (0, 0)),
                  pl.BlockSpec((1, d), lambda i: (0, 0))],
        out_specs=pl.BlockSpec((TM, d), lambda i: (i, 0)),
        compiler_params=pltpu.CompilerParams(dimension_semantics=("parallel",)),
    )(xl.reshape(M, F), w_cat_bf16, bias)
    return out.reshape(B, Np, d)


# ----------------------------------------------------------------------------
# kernel: one DiffTransformerEncoderLayer + fused masked pooling
#   grid = (B, N // TQ); K/V built once per batch element at the first query tile
#   and cached in VMEM scratch; pooled masked sum accumulated across query tiles.
# ----------------------------------------------------------------------------
def encoder_layer_kernel(xf_ref, pe_ref, am_ref, mvq_ref, invd_ref,
                         wq_ref, bq_ref, wkv_ref, bkv_ref,
                         wo_ref, bo_ref,
                         w1_ref, b1_ref, w2_ref, b2_ref,
                         g1_ref, be1_ref, g2_ref, be2_ref,
                         o_ref, pooled_ref,
                         k_sc, v_sc, pool_sc, *, nb_heads):
    n = xf_ref.shape[1]
    d = xf_ref.shape[2]
    tq = o_ref.shape[1]
    dh = d // nb_heads

    # ---- first query tile of this batch element: fused K|V projection + pool reset ----
    @pl.when(pl.program_id(1) == 0)
    def _():
        xb = xf_ref[0].astype(jnp.bfloat16)                     # (N, d)
        kv = _mm_t(xb, wkv_ref[...]) + bkv_ref[...]             # (N, 2d) f32
        k = kv[:, :d]
        v = kv[:, d:]
        k_sc[...] = jnp.swapaxes(k.reshape(n, nb_heads, dh), 0, 1).astype(jnp.bfloat16)
        v_sc[...] = jnp.swapaxes(v.reshape(n, nb_heads, dh), 0, 1).astype(jnp.bfloat16)
        pool_sc[...] = jnp.zeros_like(pool_sc)

    # ---- query tile sliced from the resident full-x block (no second x HBM stream) ----
    qstart = pl.multiple_of(pl.program_id(1) * tq, tq)
    x_q = xf_ref.at[0][pl.ds(qstart, tq), :]                    # (TQ, d) f32

    # 1/sqrt(dh) is pre-folded into wq / bq
    q = _mm_t(x_q.astype(jnp.bfloat16), wq_ref[...]) + bq_ref[...]
    qh = jnp.swapaxes(q.reshape(tq, nb_heads, dh), 0, 1).astype(jnp.bfloat16)   # (H,TQ,dh)

    kh = k_sc[...]                                              # (H, N, dh) bf16
    vh = v_sc[...]

    # head-batched scores (H, TQ, N), f32 accumulation
    scores = lax.dot_general(qh, kh, (((2,), (2,)), ((0,), (0,))),
                             preferred_element_type=jnp.float32)
    scores = scores + am_ref[...]                               # additive key-padding mask
    m = jnp.max(scores, axis=-1, keepdims=True)
    p = jnp.exp(scores - m)                                     # f32
    inv = pl.reciprocal(jnp.sum(p, axis=-1, keepdims=True), approx=True)   # (H,TQ,1)

    # diffusion-kernel modulation in bf16; softmax normalization deferred past PV matmul
    pm = p.astype(jnp.bfloat16) * pe_ref[0][None, :, :]         # (H, TQ, N) bf16
    ctx = lax.dot_general(pm, vh, (((2,), (1,)), ((0,), (0,))),
                          preferred_element_type=jnp.float32)   # (H, TQ, dh) f32
    ctx = ctx * inv                                             # tiny (H,TQ,dh) multiply
    ctx = jnp.swapaxes(ctx, 0, 1).reshape(tq, d)                # concat heads

    attn_out = _mm_t(ctx.astype(jnp.bfloat16), wo_ref[...]) + bo_ref[...]

    # residual + layernorm1
    src = _layernorm(x_q + attn_out, g1_ref[...], be1_ref[...])
    # feed-forward (relu) + residual + layernorm2
    h1 = jnp.maximum(_mm_t(src.astype(jnp.bfloat16), w1_ref[...]) + b1_ref[...], 0.0)
    h2 = _mm_t(h1.astype(jnp.bfloat16), w2_ref[...]) + b2_ref[...]
    out_tile = _layernorm(src + h2, g2_ref[...], be2_ref[...])
    o_ref[0] = out_tile

    # ---- fused masked-mean pooling (result consumed from the last layer only) ----
    mv = mvq_ref[0]                                             # (TQ, 1), 1.0 where valid
    pool_sc[...] += jnp.sum(out_tile * mv, axis=0, keepdims=True)
    @pl.when(pl.program_id(1) == pl.num_programs(1) - 1)
    def _():
        pooled_ref[0] = pool_sc[...] * invd_ref[0]


def _choose_tq(N_pad, d, nb_heads):
    """Largest query tile whose live temporaries fit a v7x-safe (~40 MiB) budget."""
    budget = 40 * 1024 * 1024
    for tq in (512, 256, 128, 64):
        if N_pad % tq:
            continue
        temps = nb_heads * tq * N_pad * (4 + 4 + 2)   # scores f32 + p f32 + p*pe bf16
        resident = (2 * N_pad * d * 2                 # K/V scratch (bf16)
                    + 2 * N_pad * d * 4               # x block double-buffered
                    + 2 * tq * N_pad * 2)             # pe tile double-buffered
        if temps + resident < budget:
            return tq
    return 64


def encoder_layer(x, pe_bf16, amask, mvq, inv_den, p, nb_heads, tq):
    B, N, d = x.shape
    ff = p['w1'].shape[0]
    dh = d // nb_heads
    nq = N // tq

    def const_spec(shape):
        nd = len(shape)
        return pl.BlockSpec(shape, lambda b, q, _n=nd: (0,) * _n)

    kern = functools.partial(encoder_layer_kernel, nb_heads=nb_heads)

    flops = int(B * (8 * N * d * d + 4 * N * N * d + 4 * N * d * ff + 2 * N * d))
    transcendentals = int(B * nb_heads * N * N)
    weight_bytes = (4 * d * d + 2 * d * ff) * 2 + (10 * d + ff) * 4
    bytes_accessed = int(B * N * d * 4 * 2        # x in + out (f32)
                         + B * N * N * 2          # pe (bf16)
                         + B * N * 8 + B * d * 4  # masks + pooled
                         + weight_bytes)

    vmem_est = int(2 * N * d * 4                      # x block (double buffered)
                   + 2 * tq * N * 2                   # pe tile
                   + 2 * weight_bytes
                   + 2 * 2 * N * d * 2                # K/V scratch + margin
                   + nb_heads * tq * N * (4 + 4 + 2)  # scores/p/p*pe live temps
                   + 8 * tq * max(d, ff) * 4)
    vmem_limit = min(64 * 1024 * 1024, max(32 * 1024 * 1024, int(1.25 * vmem_est)))

    in_specs = [
        pl.BlockSpec((1, N, d), lambda b, q: (b, 0, 0)),     # x full rows (K/V + q slice)
        pl.BlockSpec((1, tq, N), lambda b, q: (b, q, 0)),    # pe tile (bf16)
        pl.BlockSpec((1, 1, N), lambda b, q: (b, 0, 0)),     # additive key-padding mask
        pl.BlockSpec((1, tq, 1), lambda b, q: (b, q, 0)),    # query-row validity (pooling)
        pl.BlockSpec((1, 1, 1), lambda b, q: (b, 0, 0)),     # 1 / num_valid_nodes
        const_spec((d, d)), const_spec((1, d)),              # wq (pre-scaled), bq
        const_spec((2 * d, d)), const_spec((1, 2 * d)),      # packed wk|wv, bk|bv
        const_spec((d, d)), const_spec((1, d)),              # wo, bo
        const_spec((ff, d)), const_spec((1, ff)),            # w1, b1
        const_spec((d, ff)), const_spec((1, d)),             # w2, b2
        const_spec((1, d)), const_spec((1, d)),              # ln1 gamma, beta
        const_spec((1, d)), const_spec((1, d)),              # ln2 gamma, beta
    ]
    out, pooled = pl.pallas_call(
        kern,
        out_shape=(jax.ShapeDtypeStruct((B, N, d), jnp.float32),
                   jax.ShapeDtypeStruct((B, 1, d), jnp.float32)),
        grid=(B, nq),
        in_specs=in_specs,
        out_specs=(pl.BlockSpec((1, tq, d), lambda b, q: (b, q, 0)),
                   pl.BlockSpec((1, 1, d), lambda b, q: (b, 0, 0))),
        scratch_shapes=[pltpu.VMEM((nb_heads, N, dh), jnp.bfloat16),
                        pltpu.VMEM((nb_heads, N, dh), jnp.bfloat16),
                        pltpu.VMEM((1, d), jnp.float32)],
        compiler_params=pltpu.CompilerParams(
            dimension_semantics=("parallel", "arbitrary"),
            vmem_limit_bytes=vmem_limit),
        cost_estimate=pl.CostEstimate(flops=flops,
                                      transcendentals=transcendentals,
                                      bytes_accessed=bytes_accessed),
    )(x, pe_bf16, amask, mvq, inv_den,
      p['wq'], p['bq'], p['wkv'], p['bkv'],
      p['wo'], p['bo'],
      p['w1'], p['b1'], p['w2'], p['b2'],
      p['g1'], p['be1'], p['g2'], p['be2'])
    return out, pooled


# ----------------------------------------------------------------------------
# kernel: classifier  Linear -> ReLU -> Linear  (input is the fused pooled vector)
# ----------------------------------------------------------------------------
def classifier_kernel(x_ref, w1_ref, b1_ref, w2_ref, b2_ref, o_ref):
    h = jnp.maximum(_mm_t(x_ref[...].astype(jnp.bfloat16), w1_ref[...]) + b1_ref[...], 0.0)
    o_ref[...] = _mm_t(h.astype(jnp.bfloat16), w2_ref[...]) + b2_ref[...]


def classifier(h, w1_bf16, b1, w2_bf16, b2):
    B, d = h.shape
    C = w2_bf16.shape[0]
    return pl.pallas_call(
        classifier_kernel,
        out_shape=jax.ShapeDtypeStruct((B, C), jnp.float32),
        grid=(1,),
        in_specs=[pl.BlockSpec((B, d), lambda i: (0, 0)),
                  pl.BlockSpec((d, d), lambda i: (0, 0)),
                  pl.BlockSpec((1, d), lambda i: (0, 0)),
                  pl.BlockSpec((C, d), lambda i: (0, 0)),
                  pl.BlockSpec((1, C), lambda i: (0, 0))],
        out_specs=pl.BlockSpec((B, C), lambda i: (0, 0)),
    )(h, w1_bf16, b1, w2_bf16, b2)


# ----------------------------------------------------------------------------
# parameter init (deterministic, synthetic, torch layout) + one-time inference prep
# ----------------------------------------------------------------------------
def init_params(key, in_size, nb_class, d_model, dim_ff, nb_layers, lap_dim):
    keys = jax.random.split(key, 6 + nb_layers)

    def dense(k, out_f, in_f, scale=0.1):
        return scale * jax.random.normal(k, (out_f, in_f), jnp.float32)

    zeros = lambda n: jnp.zeros((n,), jnp.float32)
    ones = lambda n: jnp.ones((n,), jnp.float32)

    params = {
        'embedding_w': dense(keys[0], d_model, in_size),    # nn.Linear(in_size, d_model, bias=False)
        'lap_w': dense(keys[1], d_model, lap_dim),           # nn.Linear(lap_dim, d_model)
        'lap_b': zeros(d_model),
        'cls_w1': dense(keys[2], d_model, d_model),
        'cls_b1': zeros(d_model),
        'cls_w2': dense(keys[3], nb_class, d_model),
        'cls_b2': zeros(nb_class),
        'layers': [],
    }
    for l in range(nb_layers):
        lk = jax.random.split(keys[6 + l], 6)
        params['layers'].append(dict(
            wq=dense(lk[0], d_model, d_model), bq=zeros(d_model),
            wk=dense(lk[1], d_model, d_model), bk=zeros(d_model),
            wv=dense(lk[2], d_model, d_model), bv=zeros(d_model),
            wo=dense(lk[3], d_model, d_model), bo=zeros(d_model),
            w1=dense(lk[4], dim_ff, d_model), b1=zeros(dim_ff),
            w2=dense(lk[5], d_model, dim_ff), b2=zeros(d_model),
            g1=ones(d_model), be1=zeros(d_model),
            g2=ones(d_model), be2=zeros(d_model),
        ))
    return params


def prepare_params(params, nb_heads):
    """One-time inference prep: bf16 weights, 1/sqrt(dh) folded into wq/bq, wk|wv packed,
    embedding + lap-pos-enc weights concatenated."""
    d = params['embedding_w'].shape[0]
    dh = d // nb_heads
    scale = 1.0 / float(dh) ** 0.5
    prep = {
        'embed_w': jnp.concatenate([params['embedding_w'], params['lap_w']],
                                   axis=1).astype(jnp.bfloat16),
        'embed_b': params['lap_b'].reshape(1, d),
        'cls_w1': params['cls_w1'].astype(jnp.bfloat16),
        'cls_b1': params['cls_b1'].reshape(1, -1),
        'cls_w2': params['cls_w2'].astype(jnp.bfloat16),
        'cls_b2': params['cls_b2'].reshape(1, -1),
        'layers': [],
    }
    for p in params['layers']:
        ff = p['w1'].shape[0]
        prep['layers'].append(dict(
            wq=(p['wq'] * scale).astype(jnp.bfloat16), bq=(p['bq'] * scale).reshape(1, d),
            wkv=jnp.concatenate([p['wk'], p['wv']], axis=0).astype(jnp.bfloat16),
            bkv=jnp.concatenate([p['bk'], p['bv']], axis=0).reshape(1, 2 * d),
            wo=p['wo'].astype(jnp.bfloat16), bo=p['bo'].reshape(1, d),
            w1=p['w1'].astype(jnp.bfloat16), b1=p['b1'].reshape(1, ff),
            w2=p['w2'].astype(jnp.bfloat16), b2=p['b2'].reshape(1, d),
            g1=p['g1'].reshape(1, d), be1=p['be1'].reshape(1, d),
            g2=p['g2'].reshape(1, d), be2=p['be2'].reshape(1, d),
        ))
    return prep


def _pad_last_axes(a, target_n, axes):
    widths = [(0, 0)] * a.ndim
    for ax in axes:
        widths[ax] = (0, target_n - a.shape[ax])
    return jnp.pad(a, widths)


def diff_graph_transformer_forward(prep, x, masks, pe, x_lap_pos_enc, nb_heads):
    B, N, _ = x.shape
    d_model = prep['embed_w'].shape[0]

    # --- pad node dimension to a multiple of 128 (lane-dense scores / pe / stores) ---
    N_pad = ((N + 127) // 128) * 128
    tq = _choose_tq(N_pad, d_model, nb_heads)

    x_p = _pad_last_axes(x, N_pad, (1,))
    lap_p = _pad_last_axes(x_lap_pos_enc, N_pad, (1,))
    pe_p = _pad_last_axes(pe, N_pad, (1, 2)).astype(jnp.bfloat16)
    masks_p = jnp.pad(masks, ((0, 0), (0, N_pad - N)), constant_values=True)

    maskf = masks_p.astype(jnp.float32)                          # 1.0 where padding
    amask = (maskf * jnp.float32(-1e30)).reshape(B, 1, N_pad)    # additive key mask
    mvq = (1.0 - maskf).reshape(B, N_pad, 1)                     # 1.0 where valid node
    inv_den = 1.0 / jnp.sum(mvq, axis=1, keepdims=True)          # (B, 1, 1)

    # fused embedding (bias=False) + laplacian positional-encoding embedding
    h = fused_embedding(x_p, lap_p, prep['embed_w'], prep['embed_b'])

    pooled = None
    for lyr in prep['layers']:
        h, pooled = encoder_layer(h, pe_p, amask, mvq, inv_den, lyr, nb_heads, tq)
    # encoder.norm is None (nn.TransformerEncoder default) -> no final norm
    # masked mean pooling is fused into the encoder layer; use the last layer's result.
    return classifier(pooled[:, 0, :], prep['cls_w1'], prep['cls_b1'],
                      prep['cls_w2'], prep['cls_b2'])            # (B, nb_class)


# ----------------------------------------------------------------------------
if __name__ == "__main__":
    B, N = 2, 8
    in_size, nb_class = 4, 3
    d_model, nb_heads, dim_ff, nb_layers = 32, 4, 64, 2
    lap_dim = 8

    key = jax.random.PRNGKey(0)
    k_x, k_pe, k_lap, k_p = jax.random.split(key, 4)

    x = jax.random.normal(k_x, (B, N, in_size), jnp.float32)
    x_lap = jax.random.normal(k_lap, (B, N, lap_dim), jnp.float32)
    pe = jax.random.uniform(k_pe, (B, N, N), jnp.float32, minval=0.0, maxval=1.0)
    pe = 0.5 * (pe + jnp.transpose(pe, (0, 2, 1)))               # symmetric diffusion kernel
    # key-padding mask: True = padded node (last 2 nodes of batch 1 are padding)
    masks = jnp.zeros((B, N), jnp.bool_).at[1, N - 2:].set(True)

    params = init_params(k_p, in_size, nb_class, d_model, dim_ff, nb_layers, lap_dim)
    prep = prepare_params(params, nb_heads)

    out = diff_graph_transformer_forward(prep, x, masks, pe, x_lap, nb_heads)
    out = jax.block_until_ready(out)
    assert out.shape == (B, nb_class)
    assert bool(jnp.all(jnp.isfinite(out)))
    print("KERNEL_OK")
</pallas_src>

<mosaic_0001>
module attributes {stable_mosaic.version = 11 : i64} {
  func.func @embed_kernel(%arg0: i32, %arg1: memref<256x12xf32, #tpu.memory_space<vmem>>, %arg2: memref<32x12xbf16, #tpu.memory_space<vmem>>, %arg3: memref<1x32xf32, #tpu.memory_space<vmem>>, %arg4: memref<256x32xf32, #tpu.memory_space<vmem>>) attributes {dimension_semantics = [#tpu.dimension_semantics<parallel>], iteration_bounds = array<i64: 1>, scalar_prefetch = 0 : i64, scratch_operands = 0 : i64, tpu.core_type = #tpu.core_type<tc>, window_params = [{transform_indices = @transform_0, window_bounds = array<i64: 256, 12>}, {pipeline_mode = #tpu.pipeline_mode<synchronous>, transform_indices = @transform_1, window_bounds = array<i64: 32, 12>}, {pipeline_mode = #tpu.pipeline_mode<synchronous>, transform_indices = @transform_2, window_bounds = array<i64: 1, 32>}, {transform_indices = @transform_3, window_bounds = array<i64: 256, 32>}]} {
    %c0 = arith.constant 0 : index
    %c0_0 = arith.constant 0 : index
    %0 = vector.load %arg1[%c0, %c0_0] : memref<256x12xf32, #tpu.memory_space<vmem>>, vector<256x12xf32>
    %1 = arith.truncf %0 : vector<256x12xf32> to vector<256x12xbf16>
    %c0_1 = arith.constant 0 : index
    %c0_2 = arith.constant 0 : index
    %2 = vector.load %arg2[%c0_1, %c0_2] : memref<32x12xbf16, #tpu.memory_space<vmem>>, vector<32x12xbf16>
    %cst = arith.constant dense<0.000000e+00> : vector<256x32xf32>
    %3 = tpu.matmul %1, %2, %cst {dimension_numbers = #tpu.dot_dimension_numbers<[1], [1], [0], [0], [0, 0, 1, 0], [], []>} : vector<256x12xbf16>, vector<32x12xbf16>, vector<256x32xf32> -> vector<256x32xf32>
    %c0_3 = arith.constant 0 : index
    %c0_4 = arith.constant 0 : index
    %4 = vector.load %arg3[%c0_3, %c0_4] : memref<1x32xf32, #tpu.memory_space<vmem>>, vector<1x32xf32>
    %5 = vector.broadcast %4 : vector<1x32xf32> to vector<256x32xf32>
    %6 = arith.addf %3, %5 : vector<256x32xf32>
    %c0_5 = arith.constant 0 : index
    %c0_6 = arith.constant 0 : index
    %7 = vector.load %arg4[%c0_5, %c0_6] : memref<256x32xf32, #tpu.memory_space<vmem>>, vector<256x32xf32>
    tpu.vector_store %arg4[%c0_5, %c0_6], %6 {strides = array<i32>} : memref<256x32xf32, #tpu.memory_space<vmem>>, vector<256x32xf32>,
    return
  }
  func.func @transform_0(%arg0: i32) -> (i32, i32) {
    %c0_i32 = arith.constant 0 : i32
    %c0_i32_0 = arith.constant 0 : i32
    return %arg0, %c0_i32 : i32, i32
  }
  func.func @transform_1(%arg0: i32) -> (i32, i32) {
    %c0_i32 = arith.constant 0 : i32
    %c0_i32_0 = arith.constant 0 : i32
    %c0_i32_1 = arith.constant 0 : i32
    return %c0_i32, %c0_i32_0 : i32, i32
  }
  func.func @transform_2(%arg0: i32) -> (i32, i32) {
    %c0_i32 = arith.constant 0 : i32
    %c0_i32_0 = arith.constant 0 : i32
    %c0_i32_1 = arith.constant 0 : i32
    return %c0_i32, %c0_i32_0 : i32, i32
  }
  func.func @transform_3(%arg0: i32) -> (i32, i32) {
    %c0_i32 = arith.constant 0 : i32
    %c0_i32_0 = arith.constant 0 : i32
    return %arg0, %c0_i32 : i32, i32
  }
}

</mosaic_0001>

<bundles_post_ra>
// kernel: tpu_custom_call.1
= control target key start
LH: loop header
LB: loop body
LE: loop exit
PB: predicated region body
PF: predicated region fallthrough
CT: control target
= control target key end

     0   :  { %vm84_vm0 = vcmask 97280   ;;  %vm300_vm1 = vcmask 261120   ;;  %s729_s1 = inlined_call_operand.vmem [shape: bf16[32,12], index: 1, kind: input, shape index: {}]   ;;  %s730_s0 = inlined_call_operand.vmem [shape: f32[256,12], index: 0, kind: input, shape index: {}]   ;;  %s731_s2 = inlined_call_operand.vmem [shape: f32[1,32], index: 2, kind: input, shape index: {}]   ;;  %s732_s3 = inlined_call_operand.vmem [shape: f32[256,32], index: 3, kind: output, shape index: {}]  }
   0x1   :  { %v418_v0 = vld [vmem:[%s729_s1 + $0x8] sm:$0xff]   ;;  %v419_v1 = vld [vmem:[%s729_s1] sm:$0xff]   ;;  %v17_v10 = vld [vmem:[%s730_s0 + $0x10] sm:$0xff] }
   0x2   :  { %414 = vmatprep.subr.msk.bf16.mxu0 %vm84_vm0, %v418_v0  ;;  %415 = vmatprep.subr.msk.bf16.mxu1 %vm84_vm0, %v418_v0  ;;  %v137_v2 = vsel %vm84_vm0, %v418_v0, 0  ;;  %v15_v3 = vld [vmem:[%s730_s0] sm:$0xff]  ;;  %v16_v4 = vld [vmem:[%s730_s0 + $0x8] sm:$0xff]  ;;  %v134_v9 = vsel %vm84_vm0, %v419_v1, 0  ;;  %v18_v11 = vld [vmem:[%s730_s0 + $0x18] sm:$0xff] }
   0x3   :  { %v31_v5 = vld [vmem:[%s730_s0 + $0x80] sm:$0xff]  ;;  %375 = vmatpush3.bf16.xpose.msra.mxu0 %v137_v2  ;;  %412 = vmatpush3.bf16.xpose.msra.mxu1 %v137_v2  ;;  %v47_v6 = vpack.c.bf16 %v16_v4, %v15_v3  ;;  %v32_v7 = vld [vmem:[%s730_s0 + $0x88] sm:$0xff]  ;;  %v33_v12 = vld [vmem:[%s730_s0 + $0x90] sm:$0xff]  ;;  %v48_v18 = vpack.c.bf16 %v18_v11, %v17_v10 }
   0x4   :  { %416 = vmatprep.subr.msk.bf16.mxu0 %vm84_vm0, %v419_v1  ;;  %417 = vmatprep.subr.msk.bf16.mxu1 %vm84_vm0, %v419_v1  ;;  %v55_v8 = vpack.c.bf16 %v32_v7, %v31_v5  ;;  %v34_v13 = vld [vmem:[%s730_s0 + $0x98] sm:$0xff]  ;;  %v19_v14 = vld [vmem:[%s730_s0 + $0x20] sm:$0xff]  ;;  %v20_v15 = vld [vmem:[%s730_s0 + $0x28] sm:$0xff] }
   0x5   :  { %378 = vmatprep.mubr.msk.bf16.mxu0 %vm84_vm0, %v47_v6  ;;  %v35_v16 = vld [vmem:[%s730_s0 + $0xa0] sm:$0xff]  ;;  %v36_v17 = vld [vmem:[%s730_s0 + $0xa8] sm:$0xff]  ;;  %v56_v19 = vpack.c.bf16 %v34_v13, %v33_v12  ;;  %v49_v20 = vpack.c.bf16 %v20_v15, %v19_v14  ;;  %v21_v22 = vld [vmem:[%s730_s0 + $0x30] sm:$0xff] }
   0x6   :  { %394 = vmatprep.mubr.msk.bf16.mxu1 %vm84_vm0, %v55_v8  ;;  %v57_v21 = vpack.c.bf16 %v36_v17, %v35_v16  ;;  %v22_v23 = vld [vmem:[%s730_s0 + $0x38] sm:$0xff]  ;;  %v37_v24 = vld [vmem:[%s730_s0 + $0xb0] sm:$0xff]  ;;  %v23_v26 = vld [vmem:[%s730_s0 + $0x40] sm:$0xff] }
   0x7   :  { %v38_v25 = vld [vmem:[%s730_s0 + $0xb8] sm:$0xff]  ;;  %v24_v27 = vld [vmem:[%s730_s0 + $0x48] sm:$0xff]  ;;  %v39_v28 = vld [vmem:[%s730_s0 + $0xc0] sm:$0xff]  ;;  %v50_v30 = vpack.c.bf16 %v22_v23, %v21_v22 }
   0x8   :  { %v40_v29 = vld [vmem:[%s730_s0 + $0xc8] sm:$0xff]  ;;  %v58_v31 = vpack.c.bf16 %v38_v25, %v37_v24  ;;  %v51_v32 = vpack.c.bf16 %v24_v27, %v23_v26  ;;  %v25_v34 = vld [vmem:[%s730_s0 + $0x50] sm:$0xff]  ;;  %v26_v35 = vld [vmem:[%s730_s0 + $0x58] sm:$0xff] }
   0x9   :  { %v59_v33 = vpack.c.bf16 %v40_v29, %v39_v28  ;;  %v41_v36 = vld [vmem:[%s730_s0 + $0xd0] sm:$0xff]  ;;  %v42_v37 = vld [vmem:[%s730_s0 + $0xd8] sm:$0xff]  ;;  %v27_v38 = vld [vmem:[%s730_s0 + $0x60] sm:$0xff]  ;;  %v52_v42 = vpack.c.bf16 %v26_v35, %v25_v34 }
   0xa   :  { %v28_v39 = vld [vmem:[%s730_s0 + $0x68] sm:$0xff]  ;;  %v43_v40 = vld [vmem:[%s730_s0 + $0xe0] sm:$0xff]  ;;  %v60_v43 = vpack.c.bf16 %v42_v37, %v41_v36  ;;  %v29_v46 = vld [vmem:[%s730_s0 + $0x70] sm:$0xff] }
   0xb   :  { %377 = vmatpush3.bf16.xpose.msra.mxu0 %v134_v9  ;;  %413 = vmatpush3.bf16.xpose.msra.mxu1 %v134_v9  ;;  %v44_v41 = vld [vmem:[%s730_s0 + $0xe8] sm:$0xff]  ;;  %v53_v44 = vpack.c.bf16 %v28_v39, %v27_v38  ;;  %v30_v47 = vld [vmem:[%s730_s0 + $0x78] sm:$0xff]  ;;  %v45_v48 = vld [vmem:[%s730_s0 + $0xf0] sm:$0xff] }
   0xc   :  { %v61_v45 = vpack.c.bf16 %v44_v41, %v43_v40  ;;  %v46_v49 = vld [vmem:[%s730_s0 + $0xf8] sm:$0xff]  ;;  %v54_v50 = vpack.c.bf16 %v30_v47, %v29_v46  ;;  %v567_v52 = vld [vmem:[%s731_s2] ss:$0 sm:$0xff] }
   0xd   :  { %v62_v51 = vpack.c.bf16 %v46_v49, %v45_v48 }
  0x12   :  { %379 = vmatmul.mubr.msk.bf16.vlgmr.msra.gmra.mxu0 %vm84_vm0, %v48_v18  ;;  %395 = vmatmul.mubr.msk.bf16.vlgmr.msra.gmra.mxu1 %vm84_vm0, %v56_v19 }
  0x13   :  { %382 = vmatprep.mubr.msk.bf16.mxu0 %vm84_vm0, %v49_v20  ;;  %398 = vmatprep.mubr.msk.bf16.mxu1 %vm84_vm0, %v57_v21 }
  0x1a   :  { %383 = vmatmul.mubr.msk.bf16.gmra.mxu0 %vm84_vm0, %v50_v30  ;;  %399 = vmatmul.mubr.msk.bf16.gmra.mxu1 %vm84_vm0, %v58_v31 }
  0x1b   :  { %386 = vmatprep.mubr.msk.bf16.mxu0 %vm84_vm0, %v51_v32  ;;  %402 = vmatprep.mubr.msk.bf16.mxu1 %vm84_vm0, %v59_v33 }
  0x22   :  { %387 = vmatmul.mubr.msk.bf16.gmra.mxu0 %vm84_vm0, %v52_v42  ;;  %403 = vmatmul.mubr.msk.bf16.gmra.mxu1 %vm84_vm0, %v60_v43 }
  0x23   :  { %390 = vmatprep.mubr.msk.bf16.mxu0 %vm84_vm0, %v53_v44  ;;  %406 = vmatprep.mubr.msk.bf16.mxu1 %vm84_vm0, %v61_v45 }
  0x2a   :  { %391 = vmatmul.mubr.msk.bf16.gmra.mxu0 %vm84_vm0, %v54_v50  ;;  %407 = vmatmul.mubr.msk.bf16.gmra.mxu1 %vm84_vm0, %v62_v51 }
  0xd2   :  { %v380_v53 = vpop.f32.mrf.mxu0  ;;  %v396_v54 = vpop.f32.mrf.mxu1 }
  0xd3   :  { %v182_v55 = vadd.f32 %v380_v53, %v567_v52  ;;  %v246_v56 = vadd.f32 %v396_v54, %v567_v52 }
  0xd4   :  { %v173_v57 = vpop.f32.mrf.mxu0  ;;  %v237_v58 = vpop.f32.mrf.mxu1 }
  0xd5   :  { %303 = vst.msk [vmem:[%s732_s3 + $0x10] sm:$0xff] %vm300_vm1, %v182_v55  ;;  %319 = vst.msk [vmem:[%s732_s3 + $0x90] sm:$0xff] %vm300_vm1, %v246_v56  ;;  %v174_v59 = vadd.f32 %v567_v52, %v173_v57  ;;  %v238_v60 = vadd.f32 %v567_v52, %v237_v58 }
  0xd6   :  { %v381_v61 = vpop.f32.mrf.mxu0  ;;  %v397_v62 = vpop.f32.mrf.mxu1 }
  0xd7   :  { %301 = vst.msk [vmem:[%s732_s3] sm:$0xff] %vm300_vm1, %v174_v59  ;;  %317 = vst.msk [vmem:[%s732_s3 + $0x80] sm:$0xff] %vm300_vm1, %v238_v60  ;;  %v185_v63 = vadd.f32 %v381_v61, %v567_v52  ;;  %v249_v0 = vadd.f32 %v397_v62, %v567_v52 }
  0xd8   :  { %v176_v1 = vpop.f32.mrf.mxu0  ;;  %v240_v2 = vpop.f32.mrf.mxu1 }
  0xd9   :  { %304 = vst.msk [vmem:[%s732_s3 + $0x18] sm:$0xff] %vm300_vm1, %v185_v63  ;;  %320 = vst.msk [vmem:[%s732_s3 + $0x98] sm:$0xff] %vm300_vm1, %v249_v0  ;;  %v177_v3 = vadd.f32 %v567_v52, %v176_v1  ;;  %v241_v4 = vadd.f32 %v567_v52, %v240_v2 }
  0xda   :  { %v384_v5 = vpop.f32.mrf.mxu0  ;;  %v400_v6 = vpop.f32.mrf.mxu1 }
  0xdb   :  { %302 = vst.msk [vmem:[%s732_s3 + $0x8] sm:$0xff] %vm300_vm1, %v177_v3  ;;  %318 = vst.msk [vmem:[%s732_s3 + $0x88] sm:$0xff] %vm300_vm1, %v241_v4  ;;  %v198_v7 = vadd.f32 %v384_v5, %v567_v52  ;;  %v262_v8 = vadd.f32 %v400_v6, %v567_v52 }
  0xdc   :  { %v189_v9 = vpop.f32.mrf.mxu0  ;;  %v253_v10 = vpop.f32.mrf.mxu1 }
  0xdd   :  { %307 = vst.msk [vmem:[%s732_s3 + $0x30] sm:$0xff] %vm300_vm1, %v198_v7  ;;  %323 = vst.msk [vmem:[%s732_s3 + $0xb0] sm:$0xff] %vm300_vm1, %v262_v8  ;;  %v190_v11 = vadd.f32 %v567_v52, %v189_v9  ;;  %v254_v12 = vadd.f32 %v567_v52, %v253_v10 }
  0xde   :  { %v385_v13 = vpop.f32.mrf.mxu0  ;;  %v401_v14 = vpop.f32.mrf.mxu1 }
  0xdf   :  { %305 = vst.msk [vmem:[%s732_s3 + $0x20] sm:$0xff] %vm300_vm1, %v190_v11  ;;  %321 = vst.msk [vmem:[%s732_s3 + $0xa0] sm:$0xff] %vm300_vm1, %v254_v12  ;;  %v201_v15 = vadd.f32 %v385_v13, %v567_v52  ;;  %v265_v16 = vadd.f32 %v401_v14, %v567_v52 }
  0xe0   :  { %v192_v17 = vpop.f32.mrf.mxu0  ;;  %v256_v18 = vpop.f32.mrf.mxu1 }
  0xe1   :  { %308 = vst.msk [vmem:[%s732_s3 + $0x38] sm:$0xff] %vm300_vm1, %v201_v15  ;;  %324 = vst.msk [vmem:[%s732_s3 + $0xb8] sm:$0xff] %vm300_vm1, %v265_v16  ;;  %v193_v19 = vadd.f32 %v567_v52, %v192_v17  ;;  %v257_v20 = vadd.f32 %v567_v52, %v256_v18 }
  0xe2   :  { %v388_v21 = vpop.f32.mrf.mxu0  ;;  %v404_v22 = vpop.f32.mrf.mxu1 }
  0xe3   :  { %306 = vst.msk [vmem:[%s732_s3 + $0x28] sm:$0xff] %vm300_vm1, %v193_v19  ;;  %322 = vst.msk [vmem:[%s732_s3 + $0xa8] sm:$0xff] %vm300_vm1, %v257_v20  ;;  %v214_v23 = vadd.f32 %v388_v21, %v567_v52  ;;  %v278_v24 = vadd.f32 %v404_v22, %v567_v52 }
  0xe4   :  { %v205_v25 = vpop.f32.mrf.mxu0  ;;  %v269_v26 = vpop.f32.mrf.mxu1 }
  0xe5   :  { %311 = vst.msk [vmem:[%s732_s3 + $0x50] sm:$0xff] %vm300_vm1, %v214_v23  ;;  %327 = vst.msk [vmem:[%s732_s3 + $0xd0] sm:$0xff] %vm300_vm1, %v278_v24  ;;  %v206_v27 = vadd.f32 %v567_v52, %v205_v25  ;;  %v270_v28 = vadd.f32 %v567_v52, %v269_v26 }
  0xe6   :  { %v389_v29 = vpop.f32.mrf.mxu0  ;;  %v405_v30 = vpop.f32.mrf.mxu1 }
  0xe7   :  { %309 = vst.msk [vmem:[%s732_s3 + $0x40] sm:$0xff] %vm300_vm1, %v206_v27  ;;  %325 = vst.msk [vmem:[%s732_s3 + $0xc0] sm:$0xff] %vm300_vm1, %v270_v28  ;;  %v217_v31 = vadd.f32 %v389_v29, %v567_v52  ;;  %v281_v32 = vadd.f32 %v405_v30, %v567_v52 }
  0xe8   :  { %v208_v33 = vpop.f32.mrf.mxu0  ;;  %v272_v34 = vpop.f32.mrf.mxu1 }
  0xe9   :  { %312 = vst.msk [vmem:[%s732_s3 + $0x58] sm:$0xff] %vm300_vm1, %v217_v31  ;;  %328 = vst.msk [vmem:[%s732_s3 + $0xd8] sm:$0xff] %vm300_vm1, %v281_v32  ;;  %v209_v35 = vadd.f32 %v567_v52, %v208_v33  ;;  %v273_v36 = vadd.f32 %v567_v52, %v272_v34 }
  0xea   :  { %v392_v37 = vpop.f32.mrf.mxu0  ;;  %v408_v38 = vpop.f32.mrf.mxu1 }
  0xeb   :  { %310 = vst.msk [vmem:[%s732_s3 + $0x48] sm:$0xff] %vm300_vm1, %v209_v35  ;;  %326 = vst.msk [vmem:[%s732_s3 + $0xc8] sm:$0xff] %vm300_vm1, %v273_v36  ;;  %v230_v39 = vadd.f32 %v392_v37, %v567_v52  ;;  %v294_v40 = vadd.f32 %v408_v38, %v567_v52 }
  0xec   :  { %v221_v41 = vpop.f32.mrf.mxu0  ;;  %v285_v42 = vpop.f32.mrf.mxu1 }
  0xed   :  { %315 = vst.msk [vmem:[%s732_s3 + $0x70] sm:$0xff] %vm300_vm1, %v230_v39  ;;  %331 = vst.msk [vmem:[%s732_s3 + $0xf0] sm:$0xff] %vm300_vm1, %v294_v40  ;;  %v222_v43 = vadd.f32 %v567_v52, %v221_v41  ;;  %v286_v44 = vadd.f32 %v567_v52, %v285_v42 }
  0xee   :  { %v393_v45 = vpop.f32.mrf.mxu0  ;;  %v409_v46 = vpop.f32.mrf.mxu1 }
  0xef   :  { %313 = vst.msk [vmem:[%s732_s3 + $0x60] sm:$0xff] %vm300_vm1, %v222_v43  ;;  %329 = vst.msk [vmem:[%s732_s3 + $0xe0] sm:$0xff] %vm300_vm1, %v286_v44  ;;  %v233_v47 = vadd.f32 %v393_v45, %v567_v52  ;;  %v297_v48 = vadd.f32 %v409_v46, %v567_v52 }
  0xf0   :  { %v224_v49 = vpop.f32.mrf.mxu0  ;;  %v288_v50 = vpop.f32.mrf.mxu1 }
  0xf1   :  { %316 = vst.msk [vmem:[%s732_s3 + $0x78] sm:$0xff] %vm300_vm1, %v233_v47  ;;  %332 = vst.msk [vmem:[%s732_s3 + $0xf8] sm:$0xff] %vm300_vm1, %v297_v48  ;;  %v225_v51 = vadd.f32 %v567_v52, %v224_v49  ;;  %v289_v53 = vadd.f32 %v567_v52, %v288_v50 }
  0xf3   :  { %314 = vst.msk [vmem:[%s732_s3 + $0x68] sm:$0xff] %vm300_vm1, %v225_v51  ;;  %330 = vst.msk [vmem:[%s732_s3 + $0xe8] sm:$0xff] %vm300_vm1, %v289_v53 }

</bundles_post_ra>
